<compile_context>
chip_gen: v7x
topology: tpu7x:2x2x1
jax: 0.10.0
libtpu: 0.0.40
codegen_flags: <defaults>
</compile_context>

<pallas_src>
import functools

import jax
import jax.numpy as jnp
from jax.experimental import pallas as pl
from jax.experimental.pallas import tpu as pltpu

LANE = 128
SUBLANE = 8
MAX_BLOCK_ROWS = 4096   # 4096 x 128 f32 = 2 MiB per input block
NCORES = 2              # leading "parallel" grid axis (v7x megacore); cheap on 1-TC chips


def _nr_dice_kernel(p_ref, t_ref, num_ref, den_ref, *,
                    gamma, rows, block_rows, blocks_per_core, needs_mask):
    c = pl.program_id(0)
    i = pl.program_id(1)

    @pl.when(i == 0)
    def _():
        num_ref[...] = jnp.zeros_like(num_ref)
        den_ref[...] = jnp.zeros_like(den_ref)

    # Cast in-kernel so narrow dtypes (bf16 / int targets) stay narrow in HBM.
    p = p_ref[...].astype(jnp.float32)
    t = t_ref[...].astype(jnp.float32)

    if needs_mask:
        # Zero rows past the logical end (tail-block padding and phantom
        # blocks from the core split).  Uses the *unclamped* logical block
        # index, so a clamped duplicate load contributes exactly zero.
        row0 = (c * blocks_per_core + i) * block_rows
        gid = row0 + jax.lax.broadcasted_iota(jnp.int32, (block_rows, LANE), 0)
        valid = gid < rows
        zero = jnp.float32(0.0)
        p = jnp.where(valid, p, zero)
        t = jnp.where(valid, t, zero)

    d = jnp.abs(p - t)
    if gamma == 1.5:
        dg = d * jnp.sqrt(d)            # |d|^1.5 exactly; sqrt runs on the EUP
    elif gamma == 2.0:
        dg = d * d
    elif gamma == 1.0:
        dg = d
    else:
        # General power; guard d == 0 so exp(gamma * log(d)) stays finite.
        dg = jnp.where(d > 0.0,
                       jnp.exp(gamma * jnp.log(jnp.maximum(d, 1e-30))),
                       0.0)

    # Fold the (block_rows, 128) block down to one (8, 128) tile per quantity.
    # The reshape is layout-preserving, so this is pure VPU adds into the
    # resident output blocks (accumulator pattern).
    pn = jnp.sum(dg.reshape(-1, SUBLANE, LANE), axis=0)
    pd = jnp.sum((p * p + t * t).reshape(-1, SUBLANE, LANE), axis=0)
    num_ref[...] += pn.reshape(1, SUBLANE, LANE)
    den_ref[...] += pd.reshape(1, SUBLANE, LANE)


def noise_robust_dice_loss(predictions, targets, gamma=1.5, epsilon=1e-5):
    """JAX / Pallas equivalent of NoiseRobustDiceLoss.forward."""
    p = predictions.reshape(-1)
    t = targets.reshape(-1)
    n = p.shape[0]
    if n == 0:
        # numerator = 0, denominator = epsilon  →  0
        return jnp.float32(0.0)

    # View as (rows, 128); pad only when the flat length is not lane-aligned
    # (padded zeros contribute 0 to all three sums).  No host-side dtype cast.
    rem = n % LANE
    if rem:
        p = jnp.pad(p, (0, LANE - rem))
        t = jnp.pad(t, (0, LANE - rem))
    rows = p.shape[0] // LANE
    p2 = p.reshape(rows, LANE)
    t2 = t.reshape(rows, LANE)

    rows_up8 = ((rows + SUBLANE - 1) // SUBLANE) * SUBLANE
    block_rows = min(MAX_BLOCK_ROWS, rows_up8)
    num_blocks = (rows + block_rows - 1) // block_rows
    blocks_per_core = (num_blocks + NCORES - 1) // NCORES
    # Mask needed whenever the (NCORES x blocks_per_core) grid overshoots rows.
    needs_mask = (NCORES * blocks_per_core * block_rows) != rows
    last_block = num_blocks - 1

    def in_map(c, i):
        # Clamp so phantom / tail block indices never leave the array; the
        # in-kernel mask zeroes their contribution.
        return (jnp.minimum(c * blocks_per_core + i, last_block), 0)

    kernel = functools.partial(
        _nr_dice_kernel, gamma=float(gamma), rows=rows, block_rows=block_rows,
        blocks_per_core=blocks_per_core, needs_mask=needs_mask)

    acc_shape = jax.ShapeDtypeStruct((NCORES, SUBLANE, LANE), jnp.float32)
    acc_spec = pl.BlockSpec((1, SUBLANE, LANE), lambda c, i: (c, 0, 0))

    out_num, out_den = pl.pallas_call(
        kernel,
        out_shape=(acc_shape, acc_shape),
        grid_spec=pltpu.PrefetchScalarGridSpec(
            num_scalar_prefetch=0,
            grid=(NCORES, blocks_per_core),
            in_specs=[
                pl.BlockSpec((block_rows, LANE), in_map),
                pl.BlockSpec((block_rows, LANE), in_map),
            ],
            out_specs=[acc_spec, acc_spec],
        ),
        compiler_params=pltpu.CompilerParams(
            dimension_semantics=("parallel", "arbitrary")),
    )(p2, t2)

    num = jnp.sum(out_num)
    den = jnp.sum(out_den)
    return num / (den + jnp.float32(epsilon))


def _reference(predictions, targets, gamma=1.5, epsilon=1e-5):
    p = predictions.reshape(-1).astype(jnp.float32)
    t = targets.reshape(-1).astype(jnp.float32)
    numerator = jnp.sum(jnp.abs(p - t) ** gamma)
    denominator = jnp.sum(p ** 2) + jnp.sum(t ** 2) + epsilon
    return numerator / denominator


if __name__ == "__main__":
    key = jax.random.PRNGKey(0)
    k1, k2, k3, k4 = jax.random.split(key, 4)

    # Small shape consistent with the module (segmentation probabilities vs
    # binary targets): exercises the masked / clamped tail-block path.
    predictions = jax.random.uniform(k1, (2, 4, 16, 16), dtype=jnp.float32)
    targets = (jax.random.uniform(k2, (2, 4, 16, 16)) > 0.5).astype(jnp.float32)
    loss = jax.block_until_ready(noise_robust_dice_loss(predictions, targets))
    ref = _reference(predictions, targets)
    assert jnp.allclose(loss, ref, rtol=1e-4, atol=1e-6), (loss, ref)

    # Larger multi-block case: exercises the resident-accumulator loop, the
    # two-core split, and the unmasked (evenly divisible) fast path.
    p_big = jax.random.uniform(k3, (8, 8, 128, 128), dtype=jnp.float32)
    t_big = (jax.random.uniform(k4, (8, 8, 128, 128)) > 0.5).astype(jnp.float32)
    loss_big = jax.block_until_ready(noise_robust_dice_loss(p_big, t_big))
    ref_big = _reference(p_big, t_big)
    assert jnp.allclose(loss_big, ref_big, rtol=1e-3), (loss_big, ref_big)

    print("KERNEL_OK")
</pallas_src>

<mosaic_0001>
module attributes {stable_mosaic.version = 11 : i64} {
  func.func @_nr_dice_kernel(%arg0: i32, %arg1: i32, %arg2: memref<16x128xf32, #tpu.memory_space<vmem>>, %arg3: memref<16x128xf32, #tpu.memory_space<vmem>>, %arg4: memref<1x8x128xf32, #tpu.memory_space<vmem>>, %arg5: memref<1x8x128xf32, #tpu.memory_space<vmem>>) attributes {dimension_semantics = [#tpu.dimension_semantics<parallel>, #tpu.dimension_semantics<arbitrary>], iteration_bounds = array<i64: 2, 1>, scalar_prefetch = 0 : i64, scratch_operands = 0 : i64, tpu.core_type = #tpu.core_type<tc>, window_params = [{transform_indices = @transform_0, window_bounds = array<i64: 16, 128>}, {transform_indices = @transform_1, window_bounds = array<i64: 16, 128>}, {transform_indices = @transform_2, window_bounds = array<i64: 1, 8, 128>}, {transform_indices = @transform_3, window_bounds = array<i64: 1, 8, 128>}]} {
    %c0_i32 = arith.constant 0 : i32
    %0 = arith.cmpi eq, %arg1, %c0_i32 : i32
    %1 = arith.extui %0 : i1 to i32
    %c0_i32_0 = arith.constant 0 : i32
    %2 = arith.cmpi ne, %1, %c0_i32_0 : i32
    scf.if %2 {
      %cst_20 = arith.constant 0.000000e+00 : f32
      %36 = vector.broadcast %cst_20 : f32 to vector<1x8x128xf32>
      %c0_21 = arith.constant 0 : index
      %c0_22 = arith.constant 0 : index
      %c0_23 = arith.constant 0 : index
      %37 = vector.load %arg4[%c0_21, %c0_22, %c0_23] : memref<1x8x128xf32, #tpu.memory_space<vmem>>, vector<1x8x128xf32>
      tpu.vector_store %arg4[%c0_21, %c0_22, %c0_23], %36 {strides = array<i32>} : memref<1x8x128xf32, #tpu.memory_space<vmem>>, vector<1x8x128xf32>,
      %cst_24 = arith.constant 0.000000e+00 : f32
      %38 = vector.broadcast %cst_24 : f32 to vector<1x8x128xf32>
      %c0_25 = arith.constant 0 : index
      %c0_26 = arith.constant 0 : index
      %c0_27 = arith.constant 0 : index
      %39 = vector.load %arg5[%c0_25, %c0_26, %c0_27] : memref<1x8x128xf32, #tpu.memory_space<vmem>>, vector<1x8x128xf32>
      tpu.vector_store %arg5[%c0_25, %c0_26, %c0_27], %38 {strides = array<i32>} : memref<1x8x128xf32, #tpu.memory_space<vmem>>, vector<1x8x128xf32>,
    } else {
    }
    %c0 = arith.constant 0 : index
    %c0_1 = arith.constant 0 : index
    %3 = vector.load %arg2[%c0, %c0_1] : memref<16x128xf32, #tpu.memory_space<vmem>>, vector<16x128xf32>
    %c0_2 = arith.constant 0 : index
    %c0_3 = arith.constant 0 : index
    %4 = vector.load %arg3[%c0_2, %c0_3] : memref<16x128xf32, #tpu.memory_space<vmem>>, vector<16x128xf32>
    %c1_i32 = arith.constant 1 : i32
    %5 = arith.muli %arg0, %c1_i32 : i32
    %6 = arith.addi %5, %arg1 : i32
    %c16_i32 = arith.constant 16 : i32
    %7 = arith.muli %6, %c16_i32 : i32
    %8 = tpu.iota {dimensions = array<i32: 0>} : vector<16x128xi32>
    %9 = vector.broadcast %7 : i32 to vector<16x128xi32>
    %10 = arith.addi %9, %8 : vector<16x128xi32>
    %c16_i32_4 = arith.constant 16 : i32
    %11 = vector.broadcast %c16_i32_4 : i32 to vector<16x128xi32>
    %12 = arith.cmpi slt, %10, %11 : vector<16x128xi32>
    %cst = arith.constant 0.000000e+00 : f32
    %13 = vector.broadcast %cst : f32 to vector<16x128xf32>
    %14 = arith.select %12, %3, %13 : vector<16x128xi1>, vector<16x128xf32>
    %cst_5 = arith.constant 0.000000e+00 : f32
    %15 = vector.broadcast %cst_5 : f32 to vector<16x128xf32>
    %16 = arith.select %12, %4, %15 : vector<16x128xi1>, vector<16x128xf32>
    %17 = arith.subf %14, %16 : vector<16x128xf32>
    %18 = math.absf %17 : vector<16x128xf32>
    %19 = math.sqrt %18 : vector<16x128xf32>
    %20 = arith.mulf %18, %19 : vector<16x128xf32>
    %21 = vector.shape_cast %20 : vector<16x128xf32> to vector<2x8x128xf32>
    %cst_6 = arith.constant dense<0.000000e+00> : vector<8x128xf32>
    %22 = vector.multi_reduction <add>, %21, %cst_6 [0] : vector<2x8x128xf32> to vector<8x128xf32>
    %23 = arith.mulf %14, %14 : vector<16x128xf32>
    %24 = arith.mulf %16, %16 : vector<16x128xf32>
    %25 = arith.addf %23, %24 : vector<16x128xf32>
    %26 = vector.shape_cast %25 : vector<16x128xf32> to vector<2x8x128xf32>
    %cst_7 = arith.constant dense<0.000000e+00> : vector<8x128xf32>
    %27 = vector.multi_reduction <add>, %26, %cst_7 [0] : vector<2x8x128xf32> to vector<8x128xf32>
    %c0_8 = arith.constant 0 : index
    %c0_9 = arith.constant 0 : index
    %c0_10 = arith.constant 0 : index
    %28 = vector.load %arg4[%c0_8, %c0_9, %c0_10] : memref<1x8x128xf32, #tpu.memory_space<vmem>>, vector<1x8x128xf32>
    %29 = vector.shape_cast %22 : vector<8x128xf32> to vector<1x8x128xf32>
    %30 = arith.addf %28, %29 : vector<1x8x128xf32>
    %c0_11 = arith.constant 0 : index
    %c0_12 = arith.constant 0 : index
    %c0_13 = arith.constant 0 : index
    %31 = vector.load %arg4[%c0_11, %c0_12, %c0_13] : memref<1x8x128xf32, #tpu.memory_space<vmem>>, vector<1x8x128xf32>
    tpu.vector_store %arg4[%c0_11, %c0_12, %c0_13], %30 {strides = array<i32>} : memref<1x8x128xf32, #tpu.memory_space<vmem>>, vector<1x8x128xf32>,
    %c0_14 = arith.constant 0 : index
    %c0_15 = arith.constant 0 : index
    %c0_16 = arith.constant 0 : index
    %32 = vector.load %arg5[%c0_14, %c0_15, %c0_16] : memref<1x8x128xf32, #tpu.memory_space<vmem>>, vector<1x8x128xf32>
    %33 = vector.shape_cast %27 : vector<8x128xf32> to vector<1x8x128xf32>
    %34 = arith.addf %32, %33 : vector<1x8x128xf32>
    %c0_17 = arith.constant 0 : index
    %c0_18 = arith.constant 0 : index
    %c0_19 = arith.constant 0 : index
    %35 = vector.load %arg5[%c0_17, %c0_18, %c0_19] : memref<1x8x128xf32, #tpu.memory_space<vmem>>, vector<1x8x128xf32>
    tpu.vector_store %arg5[%c0_17, %c0_18, %c0_19], %34 {strides = array<i32>} : memref<1x8x128xf32, #tpu.memory_space<vmem>>, vector<1x8x128xf32>,
    return
  }
  func.func @transform_0(%arg0: i32, %arg1: i32) -> (i32, i32) {
    %c1_i32 = arith.constant 1 : i32
    %0 = arith.muli %arg0, %c1_i32 : i32
    %1 = arith.addi %0, %arg1 : i32
    %c0_i32 = arith.constant 0 : i32
    %2 = arith.minsi %1, %c0_i32 : i32
    %c0_i32_0 = arith.constant 0 : i32
    %c0_i32_1 = arith.constant 0 : i32
    return %2, %c0_i32_0 : i32, i32
  }
  func.func @transform_1(%arg0: i32, %arg1: i32) -> (i32, i32) {
    %c1_i32 = arith.constant 1 : i32
    %0 = arith.muli %arg0, %c1_i32 : i32
    %1 = arith.addi %0, %arg1 : i32
    %c0_i32 = arith.constant 0 : i32
    %2 = arith.minsi %1, %c0_i32 : i32
    %c0_i32_0 = arith.constant 0 : i32
    %c0_i32_1 = arith.constant 0 : i32
    return %2, %c0_i32_0 : i32, i32
  }
  func.func @transform_2(%arg0: i32, %arg1: i32) -> (i32, i32, i32) {
    %c0_i32 = arith.constant 0 : i32
    %c0_i32_0 = arith.constant 0 : i32
    %c0_i32_1 = arith.constant 0 : i32
    return %arg0, %c0_i32, %c0_i32_0 : i32, i32, i32
  }
  func.func @transform_3(%arg0: i32, %arg1: i32) -> (i32, i32, i32) {
    %c0_i32 = arith.constant 0 : i32
    %c0_i32_0 = arith.constant 0 : i32
    %c0_i32_1 = arith.constant 0 : i32
    return %arg0, %c0_i32, %c0_i32_0 : i32, i32, i32
  }
}

</mosaic_0001>

<bundles_post_ra>
// kernel: tpu_custom_call.1
= control target key start
LH: loop header
LB: loop body
LE: loop exit
PB: predicated region body
PF: predicated region fallthrough
CT: control target
= control target key end

     0   :  { %9 = vsyncpa [#allocation3], 0  ;;  %s1100_s0 = inlined_call_operand.hbm [shape: f32[16,128], index: 0, kind: input, shape index: {}]   ;;  %s1101_s1 = inlined_call_operand.hbm [shape: f32[16,128], index: 1, kind: input, shape index: {}]   ;;  %s1102_s2 = inlined_call_operand.hbm [shape: f32[2,8,128], index: 2, kind: output, shape index: {0}]   ;;  %s1103_s3 = inlined_call_operand.hbm [shape: f32[2,8,128], index: 3, kind: output, shape index: {1}]  }
   0x1   :  { %11 = vsyncpa [#allocation3 + $0x1], 0 }
   0x2   :  { %12 = vsyncpa [#allocation6], 0 }
   0x3   :  { %14 = vsyncpa [#allocation6 + $0x1], 0 }
   0x4   :  { %15 = vsyncpa [#allocation4], 0 }
   0x5   :  { %17 = vsyncpa [#allocation4 + $0x1], 0 }
   0x6   :  { %18 = vsyncpa [#allocation9], 0 }
   0x7   :  { %20 = vsyncpa [#allocation9 + $0x1], 0  ;;  %s855_s12 = smov 0   ;;  %s857_s13 = smov 0  }
   0x8   :  { %s859_s14 = smov 0   ;;  %s861_s15 = smov 0  }
   0x9   :  { %s863_s16 = smov 0   ;;  %s865_s17 = smov 0  }
   0xa   :  { %s867_s18 = smov 0   ;;  %s869_s19 = smov 0  }
   0xb LB: > { %s501_s20 = sadd.s32 4294967295, %s827_s19   ;;  %s502_s21 = sadd.s32 4294967294, %s827_s19   ;;  %s827_s19 = sphi %s869_s19, %s26_s19   ;;  %s823_s18 = sphi %s867_s18, %s1122_s18   ;;  %s819_s17 = sphi %s865_s17, %s1121_s17   ;;  %s815_s16 = sphi %s863_s16, %s1090_s16   ;;  %s811_s15 = sphi %s861_s15, %s1120_s15   ;;  %s807_s14 = sphi %s859_s14, %s1119_s14   ;;  %s803_s13 = sphi %s857_s13, %s1118_s13   ;;  %s799_s12 = sphi %s855_s12, %s1117_s12  }
   0xc   : > { %s38_s22 = sadd.s32 1, %s823_s18  ;;  %p796_p1 = scmp.ne.s32.totalorder %s815_s16, 0 }
   0xd   : > { %p40_p0 = scmp.ge.s32.totalorder %s38_s22, 2  ;;  %p59_p2 = scmp.eq.s32.totalorder %s827_s19, 0 }
   0xe   : > { %p64_p3 = scmp.ne.s32.totalorder %s815_s16, %s811_s15  ;;  %p65_p5 = scmp.eq.s32.totalorder %s501_s20, 0 }
   0xf   : > { %s1124_s22 = smov (%p40_p0, %s38_s22), 0  ;;  %p901_p4 = por %p796_p1, %p59_p2 }
  0x10   : > { %p905_p6 = por %p65_p5, %p64_p3  ;;  %s106_s25 = ssub.s32 %s823_s18, %s1124_s22 }
  0x11   : > { %p107_p7 = scmp.eq.s32.totalorder %s106_s25, 0  ;;  %s109_s26 = sadd.s32 1, %s807_s14 }
  0x12   : > { %s1107_s24 = scalar_select %p905_p6, 1, 0 }
  0x13   : > { %s913_s27 = scalar_select %p107_p7, %s807_s14, %s109_s26  }
  0x14   : > { %p119_p8 = scmp.ne.s32.totalorder %s807_s14, %s803_s13  ;;  %p120_p9 = scmp.eq.s32.totalorder %s501_s20, 1 }
  0x15   : > { %p125_p10 = scmp.ne.s32.totalorder %s803_s13, %s799_s12  ;;  %p126_p11 = scmp.eq.s32.totalorder %s502_s21, 1 }
  0x16   : > { %p919_p12 = por %p120_p9, %p119_p8  ;;  %p547_p1 = scmp.lt.s32.totalorder %s827_s19, 2 }
  0x17   : > { %p924_p0 = por %p126_p11, %p125_p10  ;;  %s829_s30 = smov [#allocation2]  }
  0x18   : > { %s1108_s28 = scalar_select %p919_p12, 1, 0 }
  0x19   : > { %s1109_s29 = scalar_select %p924_p0, 1, 0 }
  0x1a   : > { %s186_s4 = sshll.u32 %s829_s30, 4  ;;  %p931_p2 = pnand %p547_p1, %p901_p4  ;;  %s187_s4 = int_to_ptr.vmem [resolvable:$true] %s186_s4 }
  0x1b   : > { %s628_s8 = scalar_lea.hbm %s1100_s0, 256 }
  0x1c   : > { %p629_p3 = scmp.ne.s32.totalorder %s1100_s0, %s628_s8  ;;  %p630_p5 = pneg %p931_p2 }
  0x1d   : > { %p635_p8 = scmp.lt.u32.totalorder %s628_s8, %s628_s8  ;;  %p637_p9 = scmp.lt.u32.totalorder %s628_s8, %s1100_s0 }
  0x1e   : > { %p631_p7 = pnand %p630_p5, %p629_p3 }
  0x1f   : > { %p638_p10 = por %p637_p9, %p635_p8 }
  0x20   : > { %p632_p4 = pneg %p631_p7 }
  0x22   : > { %p639_p11 = pnand %p638_p10, %p632_p4 }
  0x24   : > { %642 = shalt.err (!%p639_p11)
}
  0x25   : > { %s643_s20 = scalar_lea.vmem %s187_s4, 256  ;;  %s650_s21 = scalar_lea.vmem %s187_s4, 512 }
  0x26   : > { %p644_p1 = scmp.ne.s32.totalorder %s187_s4, %s643_s20  ;;  %p651_p12 = scmp.lt.s32.totalorder %s187_s4, %s187_s4 }
  0x27   : > { %p652_p6 = scmp.lt.s32.totalorder %s650_s21, %s643_s20 }
  0x28   : > { %p646_p13 = pnand %p644_p1, %p630_p5 }
  0x29   : > { %p653_p3 = por %p652_p6, %p651_p12 }
  0x2a   : > { %p647_p0 = pneg %p646_p13 }
  0x2c   : > { %p654_p7 = pnand %p653_p3, %p647_p0 }
  0x2e   : > { %657 = shalt.err (!%p654_p7)
}
  0x2f   : > { %s830_s23 = smov 128   ;;  %s831_s25 = smov 8  }
  0x30   : > { %536 = dma.hbm_to_vmem [thread:$0]  (!%p931_p2), %s1100_s0, 256, %s187_s4, [#allocation3], %s830_s23, %s830_s23, %s831_s25  }
  0x31   : > { %p511_p13 = scmp.ge.s32.totalorder %s827_s19, 1  ;;  %p218_p4 = scmp.lt.s32.totalorder %s827_s19, 3 }
  0x32   : > { %s832_s7 = smov [#allocation5]   ;;  %s658_s11 = scalar_lea.hbm %s1101_s1, 256 }
  0x33   : > { %p962_p8 = pnand %p511_p13, %p218_p4  ;;  %s210_s8 = sshll.u32 %s832_s7, 4  ;;  %s211_s8 = int_to_ptr.vmem [resolvable:$true] %s210_s8 }
  0x34   : > { %p659_p6 = scmp.ne.s32.totalorder %s1101_s1, %s658_s11  ;;  %p665_p9 = scmp.lt.u32.totalorder %s658_s11, %s658_s11 }
  0x35   : > { %s1111_s6 = scalar_select %p962_p8, 1, 0 }
  0x36   : > { %p661_p12 = pnand %p659_p6, %p630_p5  ;;  %p667_p10 = scmp.lt.u32.totalorder %s658_s11, %s1101_s1 }
  0x38   : > { %p662_p0 = pneg %p661_p12  ;;  %p668_p11 = por %p667_p10, %p665_p9 }
  0x3a   : > { %p669_p1 = pnand %p668_p11, %p662_p0 }
  0x3c   : > { %672 = shalt.err (!%p669_p1)
}
  0x3d   : > { %s673_s26 = scalar_lea.vmem %s211_s8, 256  ;;  %s680_s30 = scalar_lea.vmem %s211_s8, 512 }
  0x3e   : > { %p674_p3 = scmp.ne.s32.totalorder %s211_s8, %s673_s26  ;;  %p681_p4 = scmp.lt.s32.totalorder %s211_s8, %s211_s8 }
  0x3f   : > { %p682_p8 = scmp.lt.s32.totalorder %s680_s30, %s673_s26 }
  0x40   : > { %p676_p7 = pnand %p674_p3, %p630_p5 }
  0x41   : > { %p683_p6 = por %p682_p8, %p681_p4 }
  0x42   : > { %p677_p13 = pneg %p676_p7 }
  0x44   : > { %p684_p12 = pnand %p683_p6, %p677_p13 }
  0x46   : > { %687 = shalt.err (!%p684_p12)
}
  0x47   : > { %539 = dma.hbm_to_vmem [thread:$0]  (!%p931_p2), %s1101_s1, 256, %s211_s8, [#allocation6], %s830_s23, %s830_s23, %s831_s25  }
  0x48   : > { %p1112_p0 = scmp.ne.s32.totalorder %s1111_s6, 0 }
  0x49   : > { %s224_s10 = sand.u32 (!%p1112_p0), 1, %s815_s16   ;;  %p1113_p5 = scmp.ne.s32.totalorder (!%p1112_p0), %s1107_s24, 0 }
  0x4a   : > { %222 = sbr.rel (%p1112_p0) target bundleno = 138 (0x8a), region = 28  ;;  %s512_s11 = sshll.u32 (!%p1112_p0), %s224_s10, 4 }
  0x4b   : > { %s225_s15 = scalar_lea.sflag (!%p1112_p0), [#allocation3], %s224_s10  ;;  %s228_s20 = scalar_lea.vmem (!%p1112_p0), [#allocation2], %s512_s11 }
  0x51   : > { %781 = dma.done.wait (%p1113_p5), %s225_s15, 256  }
  0x52   : > { %783 = vsyncadd (%p1113_p5), %s225_s15, 4294967040  ;;  %s234_s5 = scalar_lea.sflag [#allocation6], %s224_s10  ;;  %s237_s4 = scalar_lea.vmem [#allocation5], %s512_s11 }
  0x53   : > { %785 = dma.done.wait (%p1113_p5), %s234_s5, 256  }
  0x54   : > { %787 = vsyncadd (%p1113_p5), %s234_s5, 4294967040  ;;  %s516_s23 = sshll.u32 %s819_s17, 4  ;;  %v290_v0 = vlaneseq  ;;  %s1002_s25 = sand.u32 1, %s803_s13   ;;  %v284_v6 = vld [vmem:[%s228_s20] sm:$0xff]  ;;  %v285_v7 = vld [vmem:[%s228_s20 + $0x8] sm:$0xff] }
  0x55   : > { %v293_v1 = vstv %s516_s23  ;;  %v286_v8 = vld [vmem:[%s237_s4] sm:$0xff]  ;;  %s514_s6 = sshll.u32 %s1002_s25, 3  ;;  %v287_v9 = vld [vmem:[%s237_s4 + $0x8] sm:$0xff]  ;;  %s519_s24 = sshll.u32 %s819_s17, 7 }
  0x56   : > { %v291_v2 = vshrl.u32 %v290_v0, 7  ;;  %s269_s8 = scalar_lea.vmem [#allocation8], %s514_s6  ;;  %s1013_s7 = scalar_lea.hbm %s1103_s3, %s519_s24 }
  0x57   : > { %s368_s21 = sshll.u32 %s269_s8, 4  ;;  %s342_s9 = scalar_lea.sflag [#allocation9], %s1002_s25  ;;  %s1015_s21 = int_to_ptr.vmem [resolvable:$true] %s368_s21 }
  0x58   : > { %v292_v3 = vadd.s32 8, %v291_v2  ;;  %v294_v4 = vadd.s32 %v293_v1, %v291_v2  ;;  %s688_s10 = scalar_lea.vmem %s1015_s21, 128  ;;  %p1114_p8 = scmp.ne.s32.totalorder %s1108_s28, 0 }
  0x59   : > { %p689_p2 = scmp.ne.s32.totalorder %s1015_s21, %s688_s10  ;;  %s833_s11 = smov [#allocation8]  }
  0x5a   : > { %v295_v5 = vadd.s32 %v293_v1, %v292_v3  ;;  %vm296_vm0 = vcmp.lt.s32.totalorder %v294_v4, 16  ;;  %s692_s15 = sshll.u32 %s833_s11, 4  ;;  %s693_s15 = int_to_ptr.vmem [resolvable:$false] %s692_s15 }
  0x5b   : > { %v298_v10 = vsel %vm296_vm0, %v284_v6, 0.0  ;;  %v300_v11 = vsel %vm296_vm0, %v286_v8, 0.0  ;;  %p690_p9 = pnand %p689_p2, %p1114_p8  ;;  %s694_s20 = scalar_lea.vmem %s693_s15, 256 }
  0x5c   : > { %vm297_vm1 = vcmp.lt.s32.totalorder %v295_v5, 16  ;;  %v302_v14 = vsub.f32 %v298_v10, %v300_v11  ;;  %v323_v15 = vmul.f32 %v298_v10, %v298_v10  ;;  %v325_v18 = vmul.f32 %v300_v11, %v300_v11  ;;  %p695_p11 = scmp.lt.s32.totalorder %s1015_s21, %s693_s15  ;;  %p696_p1 = scmp.lt.s32.totalorder %s694_s20, %s688_s10 }
  0x5d   : > { %v299_v12 = vsel %vm297_vm1, %v285_v7, 0.0  ;;  %v301_v13 = vsel %vm297_vm1, %v287_v9, 0.0  ;;  %p691_p10 = pneg %p690_p9 }
  0x5e   : > { %v303_v16 = vsub.f32 %v299_v12, %v301_v13  ;;  %v324_v17 = vmul.f32 %v299_v12, %v299_v12  ;;  %v326_v19 = vmul.f32 %v301_v13, %v301_v13  ;;  %v304_v20 = vand.u32 2147483647, %v302_v14  ;;  %p697_p3 = por %p696_p1, %p695_p11 }
  0x5f   : > { %v327_v22 = vadd.f32 %v325_v18, %v323_v15 }
  0x60   : > { %v305_v21 = vand.u32 2147483647, %v303_v16  ;;  %v328_v23 = vadd.f32 %v326_v19, %v324_v17  ;;  %624 = vrsqrt.f32 %v304_v20  ;;  %p698_p7 = pnand %p697_p3, %p691_p10 }
  0x62   : > { %626 = vrsqrt.f32 %v305_v21  ;;  %v329_v24 = vadd.f32 %v328_v23, %v327_v22 }
  0x64   : > { %335 = vst [vmem:[%s269_s8] sm:$0xff] %v329_v24 }
  0x65   : > { %701 = shalt.err (!%p698_p7)
}
  0x66   : > { %s702_s5 = scalar_lea.hbm %s1013_s7, 128  ;;  %s706_s8 = scalar_lea.hbm %s1103_s3, 256 }
  0x67   : > { %p703_p13 = scmp.ne.s32.totalorder %s1013_s7, %s702_s5  ;;  %p707_p12 = scmp.lt.u32.totalorder %s1013_s7, %s1103_s3 }
  0x68   : > { %p708_p0 = scmp.lt.u32.totalorder %s706_s8, %s702_s5  ;;  %p710_p2 = scmp.lt.u32.totalorder %s702_s5, %s1013_s7 }
  0x69   : > { %p704_p4 = pnand %p703_p13, %p1114_p8 }
  0x6a   : > { %p709_p5 = por %p708_p0, %p707_p12 }
  0x6b   : > { %p705_p6 = pneg %p704_p4 }
  0x6c   : > { %p711_p9 = por %p710_p2, %p709_p5 }
  0x6e   : > { %p712_p10 = pnand %p711_p9, %p705_p6 }
  0x70   : > { %715 = shalt.err (!%p712_p10)
}
  0x71   : > { %530 = dma.vmem_to_hbm [thread:$0]  (%p1114_p8), %s1015_s21, 128, %s1013_s7, %s342_s9   ;;  %v625_v25 = vpop.eup %624  ;;  %vm308_vm2 = vcmp.eq.f32.partialorder %v304_v20, inf  ;;  %v311_v26 = vand.u32 2147483648, %v304_v20  ;;  %vm310_vm3 = vcmp.eq.f32.partialorder %v304_v20, 0.0  ;;  %vm315_vm4 = vcmp.eq.f32.partialorder %v305_v21, inf }
  0x72   : > { %v627_v27 = vpop.eup %626  ;;  %v307_v28 = vmul.f32 %v625_v25, %v304_v20  ;;  %v318_v29 = vand.u32 2147483648, %v305_v21  ;;  %vm317_vm5 = vcmp.eq.f32.partialorder %v305_v21, 0.0  ;;  %s262_s21 = scalar_lea.vmem [#allocation7], %s514_s6  ;;  %s1046_s11 = scalar_lea.hbm %s1102_s2, %s519_s24 }
  0x73   : > { %v314_v30 = vmul.f32 %v627_v27, %v305_v21  ;;  %s355_s7 = sshll.u32 %s262_s21, 4  ;;  %s337_s15 = scalar_lea.sflag [#allocation4], %s1002_s25  ;;  %s1048_s7 = int_to_ptr.vmem [resolvable:$true] %s355_s7 }
  0x74   : > { %v309_v31 = vsel %vm308_vm2, %v304_v20, %v307_v28  ;;  %s716_s20 = scalar_lea.vmem %s1048_s7, 128  ;;  %s834_s6 = smov [#allocation7]  }
  0x75   : > { %v312_v32 = vsel %vm310_vm3, %v311_v26, %v309_v31  ;;  %v316_v33 = vsel %vm315_vm4, %v305_v21, %v314_v30  ;;  %p717_p11 = scmp.ne.s32.totalorder %s1048_s7, %s716_s20  ;;  %s720_s5 = sshll.u32 %s834_s6, 4  ;;  %s721_s5 = int_to_ptr.vmem [resolvable:$false] %s720_s5 }
  0x76   : > { %v319_v34 = vsel %vm317_vm5, %v318_v29, %v316_v33  ;;  %v320_v35 = vmul.f32 %v312_v32, %v304_v20  ;;  %s722_s17 = scalar_lea.vmem %s721_s5, 256  ;;  %p723_p7 = scmp.lt.s32.totalorder %s1048_s7, %s721_s5 }
  0x77   : > { %v321_v36 = vmul.f32 %v319_v34, %v305_v21  ;;  %p718_p1 = pnand %p717_p11, %p1114_p8  ;;  %p724_p13 = scmp.lt.s32.totalorder %s722_s17, %s716_s20 }
  0x79   : > { %v322_v37 = vadd.f32 %v321_v36, %v320_v35  ;;  %p719_p3 = pneg %p718_p1  ;;  %p725_p4 = por %p724_p13, %p723_p7 }
  0x7b   : > { %332 = vst [vmem:[%s262_s21] sm:$0xff] %v322_v37  ;;  %p726_p6 = pnand %p725_p4, %p719_p3 }
  0x7d   : > { %729 = shalt.err (!%p726_p6)
}
  0x7e   : > { %s730_s25 = scalar_lea.hbm %s1046_s11, 128  ;;  %s734_s23 = scalar_lea.hbm %s1102_s2, 256 }
  0x7f   : > { %p731_p12 = scmp.ne.s32.totalorder %s1046_s11, %s730_s25  ;;  %p735_p2 = scmp.lt.u32.totalorder %s1046_s11, %s1102_s2 }
  0x80   : > { %p736_p9 = scmp.lt.u32.totalorder %s734_s23, %s730_s25  ;;  %p738_p11 = scmp.lt.u32.totalorder %s730_s25, %s1046_s11 }
  0x81   : > { %p732_p0 = pnand %p731_p12, %p1114_p8 }
  0x82   : > { %p737_p10 = por %p736_p9, %p735_p2 }
  0x83   : > { %p733_p5 = pneg %p732_p0 }
  0x84   : > { %p739_p1 = por %p738_p11, %p737_p10 }
  0x86   : > { %p740_p3 = pnand %p739_p1, %p733_p5 }
  0x88   : > { %743 = shalt.err (!%p740_p3)
}
  0x89   : > { %529 = dma.vmem_to_hbm [thread:$0]  (%p1114_p8), %s1048_s7, 128, %s1046_s11, %s337_s15  }
  0x8a PF: > { %s380_s30 = sand.u32 1, %s799_s12   ;;  %p1115_p7 = scmp.ne.s32.totalorder %s1109_s29, 0 }
  0x8b   : > { %p1116_p13 = scmp.ge.s32.totalorder %s827_s19, 2  ;;  %s381_s21 = scalar_lea.sflag [#allocation4], %s380_s30 }
  0x8d   : > { %p541_p4 = pnand %p1116_p13, %p1115_p7 }
  0x8f   : > { %789 = dma.done.wait (!%p541_p4), %s381_s21, 128  }
  0x90   : > { %791 = vsyncadd (!%p541_p4), %s381_s21, 4294967168  ;;  %s390_s9 = scalar_lea.sflag [#allocation9], %s380_s30 }
  0x91   : > { %793 = dma.done.wait (!%p541_p4), %s390_s9, 128  }
  0x92   : > { %795 = vsyncadd (!%p541_p4), %s390_s9, 4294967168  ;;  %s26_s19 = sadd.s32 1, %s827_s19   ;;  %s1117_s12 = smov %s803_s13 }
  0x93   : > { %p23_p6 = scmp.ge.s32.totalorder %s26_s19, 4   ;;  %s1118_s13 = smov %s807_s14 }
  0x94   : > { %s1119_s14 = smov %s913_s27  ;;  %s1120_s15 = smov %s815_s16 }
  0x95   : > { %s1090_s16 = smov 0   ;;  %s1121_s17 = smov %s823_s18 }
  0x96   : > { %s1122_s18 = smov %s1124_s22  ;;  %25 = sbr.rel (!%p23_p6) target bundleno = 11 (0xb), region = 107 }
  0x9d   :  { %395 = vsyncpa [#allocation3], 1 }
  0x9e   :  { %397 = vsyncpa [#allocation3 + $0x1], 1 }
  0x9f   :  { %398 = vsyncpa [#allocation6], 1 }
  0xa0   :  { %400 = vsyncpa [#allocation6 + $0x1], 1 }
  0xa1   :  { %401 = vsyncpa [#allocation4], 1 }
  0xa2   :  { %403 = vsyncpa [#allocation4 + $0x1], 1 }
  0xa3   :  { %404 = vsyncpa [#allocation9], 1 }
  0xa4   :  { %406 = vsyncpa [#allocation9 + $0x1], 1 }

</bundles_post_ra>
